<compile_context>
chip_gen: v7x
topology: tpu7x:2x2x1
jax: 0.10.0
libtpu: 0.0.40
codegen_flags: <defaults>
</compile_context>

<pallas_src>
import functools

import jax
import jax.numpy as jnp
from jax.experimental import pallas as pl
from jax.experimental.pallas import tpu as pltpu


def _nb1d_kernel(x_ref, w_ref, b_ref, o_ref, *, dil, H, W):
    """x_ref block (1, C, H*W); w_ref (4, C, 3C); b_ref (4, C, 1)."""
    C = x_ref.shape[1]
    HW = H * W
    x = x_ref[0].astype(jnp.float32)                       # (C, HW), lane-dense

    # Lane-position iota / image-column index, computed once and reused.
    idx = jax.lax.broadcasted_iota(jnp.int32, (1, HW), 1)  # flat spatial index
    col = idx % W                                          # w-coordinate

    def shift(a, s, mask):
        # out[:, i] = a[:, i + s], zero outside the valid range; s is a static
        # python int.  roll is an XLU lane rotation (no VMEM copies).
        rolled = pltpu.roll(a, (-s) % HW, axis=1)
        return jnp.where(mask, rolled, 0.0)

    def conv3(a, i, d, along_h):
        # Fused 3-tap 1-D conv: one (C,3C)@(3C,HW) MXU matmul per conv.
        if along_h:
            s = d * W                                      # H shift == d*W flat rows
            m_neg, m_pos = idx >= s, idx < HW - s
        else:
            s = d                                          # W shift, mask row wrap
            m_neg, m_pos = col >= d, col < W - d
        a_cat = jnp.concatenate(
            [shift(a, -s, m_neg), a, shift(a, s, m_pos)], axis=0)   # (3C, HW)
        return jnp.dot(w_ref[i], a_cat,
                       preferred_element_type=jnp.float32) + b_ref[i]

    y = jnp.maximum(conv3(x, 0, 1, True), 0.0)     # conv3x1_1 -> relu
    y = jnp.maximum(conv3(y, 1, 1, False), 0.0)    # conv1x3_1 -> bn1 (folded) -> relu
    y = jnp.maximum(conv3(y, 2, dil, True), 0.0)   # conv3x1_2 (dilated) -> relu
    y = conv3(y, 3, dil, False)                    # conv1x3_2 (dilated) -> bn2 (folded)
    # dropout: p == 0 (and eval-mode Dropout2d is identity) -> skip
    o_ref[0] = jnp.maximum(y + x, 0.0).astype(o_ref.dtype)   # residual + relu


def non_bottleneck_1d_forward(x_nchw, params, dilated):
    """Pallas forward. x_nchw: (N, C, H, W) float32 -> (N, C, H, W) float32."""
    N, C, H, W = x_nchw.shape
    HW = H * W
    # Free reshape -- stays in NCHW order, channel lands on the sublane axis.
    x = x_nchw.reshape(N, C, HW).astype(jnp.float32)

    eps = 1e-3  # matches nn.BatchNorm2d(chann, eps=0.001)
    bn1_scale = params["bn1_gamma"] / jnp.sqrt(params["bn1_var"] + eps)
    bn1_shift = params["bn1_beta"] - params["bn1_mean"] * bn1_scale
    bn2_scale = params["bn2_gamma"] / jnp.sqrt(params["bn2_var"] + eps)
    bn2_shift = params["bn2_beta"] - params["bn2_mean"] * bn2_scale

    def fuse(w_pt, along_h):
        # PyTorch (Cout, Cin, 3, 1) / (Cout, Cin, 1, 3) -> (Cout, 3*Cin),
        # tap-major blocks matching the [-d, 0, +d] concat order in the kernel.
        w = w_pt[:, :, :, 0] if along_h else w_pt[:, :, 0, :]   # (Cout, Cin, 3)
        return jnp.transpose(w, (0, 2, 1)).reshape(C, 3 * C)

    w1 = fuse(params["w1"], True)
    w2 = bn1_scale[:, None] * fuse(params["w2"], False)    # fold bn1 scale
    w3 = fuse(params["w3"], True)
    w4 = bn2_scale[:, None] * fuse(params["w4"], False)    # fold bn2 scale
    b1 = params["b1"]
    b2 = bn1_scale * params["b2"] + bn1_shift               # fold bn1 shift
    b3 = params["b3"]
    b4 = bn2_scale * params["b4"] + bn2_shift               # fold bn2 shift

    w_packed = jnp.stack([w1, w2, w3, w4]).astype(jnp.float32)            # (4, C, 3C)
    b_packed = jnp.stack([b1, b2, b3, b4]).astype(jnp.float32)[..., None]  # (4, C, 1)

    out = pl.pallas_call(
        functools.partial(_nb1d_kernel, dil=dilated, H=H, W=W),
        out_shape=jax.ShapeDtypeStruct((N, C, HW), jnp.float32),
        grid=(N,),
        in_specs=[
            pl.BlockSpec((1, C, HW), lambda n: (n, 0, 0)),
            pl.BlockSpec((4, C, 3 * C), lambda n: (0, 0, 0)),
            pl.BlockSpec((4, C, 1), lambda n: (0, 0, 0)),
        ],
        out_specs=pl.BlockSpec((1, C, HW), lambda n: (n, 0, 0)),
        # For real ERFNet sizes (C=128, H*W~8K) raise vmem_limit_bytes via
        # pltpu.CompilerParams(vmem_limit_bytes=...) or tile the H*W axis.
        compiler_params=pltpu.CompilerParams(
            dimension_semantics=("parallel",)),
    )(x, w_packed, b_packed)

    return out.reshape(N, C, H, W)


def _ref_forward(x, p, d):
    """Pure-JAX reference (lax.conv_general_dilated), NCHW, eval-mode BN."""
    eps = 1e-3

    def conv(a, w, b, pad, dil):
        y = jax.lax.conv_general_dilated(
            a, w, window_strides=(1, 1), padding=pad, rhs_dilation=dil,
            dimension_numbers=("NCHW", "OIHW", "NCHW"))
        return y + b[None, :, None, None]

    def bn(a, g, bt, m, v):
        return ((a - m[None, :, None, None])
                / jnp.sqrt(v[None, :, None, None] + eps)
                * g[None, :, None, None] + bt[None, :, None, None])

    y = jax.nn.relu(conv(x, p["w1"], p["b1"], ((1, 1), (0, 0)), (1, 1)))
    y = conv(y, p["w2"], p["b2"], ((0, 0), (1, 1)), (1, 1))
    y = jax.nn.relu(bn(y, p["bn1_gamma"], p["bn1_beta"],
                       p["bn1_mean"], p["bn1_var"]))
    y = jax.nn.relu(conv(y, p["w3"], p["b3"], ((d, d), (0, 0)), (d, 1)))
    y = conv(y, p["w4"], p["b4"], ((0, 0), (d, d)), (1, d))
    y = bn(y, p["bn2_gamma"], p["bn2_beta"], p["bn2_mean"], p["bn2_var"])
    return jax.nn.relu(y + x)


def _make_params(key, chann):
    ks = jax.random.split(key, 16)
    C = chann
    return {
        "w1": 0.2 * jax.random.normal(ks[0], (C, C, 3, 1), jnp.float32),
        "b1": 0.1 * jax.random.normal(ks[1], (C,), jnp.float32),
        "w2": 0.2 * jax.random.normal(ks[2], (C, C, 1, 3), jnp.float32),
        "b2": 0.1 * jax.random.normal(ks[3], (C,), jnp.float32),
        "w3": 0.2 * jax.random.normal(ks[4], (C, C, 3, 1), jnp.float32),
        "b3": 0.1 * jax.random.normal(ks[5], (C,), jnp.float32),
        "w4": 0.2 * jax.random.normal(ks[6], (C, C, 1, 3), jnp.float32),
        "b4": 0.1 * jax.random.normal(ks[7], (C,), jnp.float32),
        "bn1_gamma": 1.0 + 0.1 * jax.random.normal(ks[8], (C,), jnp.float32),
        "bn1_beta": 0.1 * jax.random.normal(ks[9], (C,), jnp.float32),
        "bn1_mean": 0.1 * jax.random.normal(ks[10], (C,), jnp.float32),
        "bn1_var": jax.random.uniform(ks[11], (C,), jnp.float32, 0.5, 1.5),
        "bn2_gamma": 1.0 + 0.1 * jax.random.normal(ks[12], (C,), jnp.float32),
        "bn2_beta": 0.1 * jax.random.normal(ks[13], (C,), jnp.float32),
        "bn2_mean": 0.1 * jax.random.normal(ks[14], (C,), jnp.float32),
        "bn2_var": jax.random.uniform(ks[15], (C,), jnp.float32, 0.5, 1.5),
    }


if __name__ == "__main__":
    # non_bottleneck_1d(chann=8, dropprob=0.0, dilated=2)
    chann, dilated = 8, 2
    B, H, W = 2, 16, 16

    key = jax.random.PRNGKey(0)
    k_x, k_p = jax.random.split(key)
    x = jax.random.normal(k_x, (B, chann, H, W), jnp.float32)
    params = _make_params(k_p, chann)

    out = non_bottleneck_1d_forward(x, params, dilated)
    out = jax.block_until_ready(out)

    ref = jax.block_until_ready(_ref_forward(x, params, dilated))
    assert out.shape == ref.shape == (B, chann, H, W)
    assert jnp.allclose(out, ref, rtol=1e-3, atol=1e-3), (
        float(jnp.max(jnp.abs(out - ref))))

    # TODO(synk): training-mode Dropout2d (random channel zeroing) and
    # training-mode BN statistics not implemented; module runs in inference
    # mode with dropprob=0, matching the reference semantics used here.
    print("KERNEL_OK")
</pallas_src>

<mosaic_0001>
module attributes {stable_mosaic.version = 11 : i64} {
  func.func @_nb1d_kernel(%arg0: i32, %arg1: memref<1x8x256xf32, #tpu.memory_space<vmem>>, %arg2: memref<4x8x24xf32, #tpu.memory_space<vmem>>, %arg3: memref<4x8x1xf32, #tpu.memory_space<vmem>>, %arg4: memref<1x8x256xf32, #tpu.memory_space<vmem>>) attributes {dimension_semantics = [#tpu.dimension_semantics<parallel>], iteration_bounds = array<i64: 2>, scalar_prefetch = 0 : i64, scratch_operands = 0 : i64, tpu.core_type = #tpu.core_type<tc>, window_params = [{transform_indices = @transform_0, window_bounds = array<i64: 1, 8, 256>}, {pipeline_mode = #tpu.pipeline_mode<synchronous>, transform_indices = @transform_1, window_bounds = array<i64: 4, 8, 24>}, {pipeline_mode = #tpu.pipeline_mode<synchronous>, transform_indices = @transform_2, window_bounds = array<i64: 4, 8, 1>}, {transform_indices = @transform_3, window_bounds = array<i64: 1, 8, 256>}]} {
    %c0 = arith.constant 0 : index
    %c0_0 = arith.constant 0 : index
    %c0_1 = arith.constant 0 : index
    %0 = vector.load %arg1[%c0, %c0_0, %c0_1] : memref<1x8x256xf32, #tpu.memory_space<vmem>>, vector<1x8x256xf32>
    %1 = vector.shape_cast %0 : vector<1x8x256xf32> to vector<8x256xf32>
    %2 = tpu.iota {dimensions = array<i32: 1>} : vector<1x256xi32>
    %c16_i32 = arith.constant 16 : i32
    %c0_i32 = arith.constant 0 : i32
    %3 = arith.cmpi eq, %c16_i32, %c0_i32 : i32
    %c1_i32 = arith.constant 1 : i32
    %4 = arith.select %3, %c1_i32, %c16_i32 : i32
    %5 = vector.broadcast %4 : i32 to vector<1x256xi32>
    %6 = arith.remsi %2, %5 : vector<1x256xi32>
    %c0_i32_2 = arith.constant 0 : i32
    %7 = vector.broadcast %c0_i32_2 : i32 to vector<1x256xi32>
    %8 = arith.cmpi ne, %6, %7 : vector<1x256xi32>
    %c0_i32_3 = arith.constant 0 : i32
    %9 = vector.broadcast %c0_i32_3 : i32 to vector<1x256xi32>
    %10 = arith.cmpi slt, %6, %9 : vector<1x256xi32>
    %c0_i32_4 = arith.constant 0 : i32
    %11 = arith.cmpi slt, %4, %c0_i32_4 : i32
    %12 = vector.broadcast %11 : i1 to vector<1x256xi1>
    %13 = vector.broadcast %12 : vector<1x256xi1> to vector<1x256xi1>
    %14 = arith.xori %10, %13 : vector<1x256xi1>
    %15 = arith.andi %14, %8 : vector<1x256xi1>
    %16 = vector.broadcast %4 : i32 to vector<1x256xi32>
    %17 = arith.addi %6, %16 : vector<1x256xi32>
    %18 = arith.select %15, %17, %6 : vector<1x256xi1>, vector<1x256xi32>
    %c16_i32_5 = arith.constant 16 : i32
    %19 = vector.broadcast %c16_i32_5 : i32 to vector<1x256xi32>
    %20 = arith.cmpi sge, %2, %19 : vector<1x256xi32>
    %c240_i32 = arith.constant 240 : i32
    %21 = vector.broadcast %c240_i32 : i32 to vector<1x256xi32>
    %22 = arith.cmpi slt, %2, %21 : vector<1x256xi32>
    %c16_i32_6 = arith.constant 16 : i32
    %23 = tpu.dynamic_rotate %1 by %c16_i32_6 dim 1 : vector<8x256xf32>, i32 -> vector<8x256xf32>
    %cst = arith.constant 0.000000e+00 : f32
    %24 = vector.shape_cast %20 : vector<1x256xi1> to vector<1x256xi1>
    %25 = vector.broadcast %24 : vector<1x256xi1> to vector<8x256xi1>
    %26 = vector.broadcast %cst : f32 to vector<8x256xf32>
    %27 = arith.select %25, %23, %26 : vector<8x256xi1>, vector<8x256xf32>
    %c240_i32_7 = arith.constant 240 : i32
    %28 = tpu.dynamic_rotate %1 by %c240_i32_7 dim 1 : vector<8x256xf32>, i32 -> vector<8x256xf32>
    %cst_8 = arith.constant 0.000000e+00 : f32
    %29 = vector.shape_cast %22 : vector<1x256xi1> to vector<1x256xi1>
    %30 = vector.broadcast %29 : vector<1x256xi1> to vector<8x256xi1>
    %31 = vector.broadcast %cst_8 : f32 to vector<8x256xf32>
    %32 = arith.select %30, %28, %31 : vector<8x256xi1>, vector<8x256xf32>
    %33 = tpu.concatenate %27, %1, %32 in 0 : vector<8x256xf32>, vector<8x256xf32>, vector<8x256xf32> -> vector<24x256xf32>
    %c0_9 = arith.constant 0 : index
    %c0_10 = arith.constant 0 : index
    %c0_11 = arith.constant 0 : index
    %34 = vector.load %arg2[%c0_9, %c0_10, %c0_11] : memref<4x8x24xf32, #tpu.memory_space<vmem>>, vector<1x8x24xf32>
    %35 = vector.shape_cast %34 : vector<1x8x24xf32> to vector<8x24xf32>
    %cst_12 = arith.constant dense<0.000000e+00> : vector<8x256xf32>
    %36 = tpu.matmul %35, %33, %cst_12 {dimension_numbers = #tpu.dot_dimension_numbers<[1], [0], [0], [1], [0, 0, 1, 1], [], []>} : vector<8x24xf32>, vector<24x256xf32>, vector<8x256xf32> -> vector<8x256xf32>
    %c0_13 = arith.constant 0 : index
    %c0_14 = arith.constant 0 : index
    %c0_15 = arith.constant 0 : index
    %37 = vector.load %arg3[%c0_13, %c0_14, %c0_15] : memref<4x8x1xf32, #tpu.memory_space<vmem>>, vector<1x8x1xf32>
    %38 = vector.shape_cast %37 : vector<1x8x1xf32> to vector<8x1xf32>
    %39 = vector.broadcast %38 : vector<8x1xf32> to vector<8x256xf32>
    %40 = arith.addf %36, %39 : vector<8x256xf32>
    %cst_16 = arith.constant 0.000000e+00 : f32
    %41 = vector.broadcast %cst_16 : f32 to vector<8x256xf32>
    %42 = arith.maximumf %40, %41 : vector<8x256xf32>
    %c1_i32_17 = arith.constant 1 : i32
    %43 = vector.broadcast %c1_i32_17 : i32 to vector<1x256xi32>
    %44 = arith.cmpi sge, %18, %43 : vector<1x256xi32>
    %c15_i32 = arith.constant 15 : i32
    %45 = vector.broadcast %c15_i32 : i32 to vector<1x256xi32>
    %46 = arith.cmpi slt, %18, %45 : vector<1x256xi32>
    %c1_i32_18 = arith.constant 1 : i32
    %47 = tpu.dynamic_rotate %42 by %c1_i32_18 dim 1 : vector<8x256xf32>, i32 -> vector<8x256xf32>
    %cst_19 = arith.constant 0.000000e+00 : f32
    %48 = vector.shape_cast %44 : vector<1x256xi1> to vector<1x256xi1>
    %49 = vector.broadcast %48 : vector<1x256xi1> to vector<8x256xi1>
    %50 = vector.broadcast %cst_19 : f32 to vector<8x256xf32>
    %51 = arith.select %49, %47, %50 : vector<8x256xi1>, vector<8x256xf32>
    %c255_i32 = arith.constant 255 : i32
    %52 = tpu.dynamic_rotate %42 by %c255_i32 dim 1 : vector<8x256xf32>, i32 -> vector<8x256xf32>
    %cst_20 = arith.constant 0.000000e+00 : f32
    %53 = vector.shape_cast %46 : vector<1x256xi1> to vector<1x256xi1>
    %54 = vector.broadcast %53 : vector<1x256xi1> to vector<8x256xi1>
    %55 = vector.broadcast %cst_20 : f32 to vector<8x256xf32>
    %56 = arith.select %54, %52, %55 : vector<8x256xi1>, vector<8x256xf32>
    %57 = tpu.concatenate %51, %42, %56 in 0 : vector<8x256xf32>, vector<8x256xf32>, vector<8x256xf32> -> vector<24x256xf32>
    %c1 = arith.constant 1 : index
    %c0_21 = arith.constant 0 : index
    %c0_22 = arith.constant 0 : index
    %58 = vector.load %arg2[%c1, %c0_21, %c0_22] : memref<4x8x24xf32, #tpu.memory_space<vmem>>, vector<1x8x24xf32>
    %59 = vector.shape_cast %58 : vector<1x8x24xf32> to vector<8x24xf32>
    %cst_23 = arith.constant dense<0.000000e+00> : vector<8x256xf32>
    %60 = tpu.matmul %59, %57, %cst_23 {dimension_numbers = #tpu.dot_dimension_numbers<[1], [0], [0], [1], [0, 0, 1, 1], [], []>} : vector<8x24xf32>, vector<24x256xf32>, vector<8x256xf32> -> vector<8x256xf32>
    %c1_24 = arith.constant 1 : index
    %c0_25 = arith.constant 0 : index
    %c0_26 = arith.constant 0 : index
    %61 = vector.load %arg3[%c1_24, %c0_25, %c0_26] : memref<4x8x1xf32, #tpu.memory_space<vmem>>, vector<1x8x1xf32>
    %62 = vector.shape_cast %61 : vector<1x8x1xf32> to vector<8x1xf32>
    %63 = vector.broadcast %62 : vector<8x1xf32> to vector<8x256xf32>
    %64 = arith.addf %60, %63 : vector<8x256xf32>
    %cst_27 = arith.constant 0.000000e+00 : f32
    %65 = vector.broadcast %cst_27 : f32 to vector<8x256xf32>
    %66 = arith.maximumf %64, %65 : vector<8x256xf32>
    %c32_i32 = arith.constant 32 : i32
    %67 = vector.broadcast %c32_i32 : i32 to vector<1x256xi32>
    %68 = arith.cmpi sge, %2, %67 : vector<1x256xi32>
    %c224_i32 = arith.constant 224 : i32
    %69 = vector.broadcast %c224_i32 : i32 to vector<1x256xi32>
    %70 = arith.cmpi slt, %2, %69 : vector<1x256xi32>
    %c32_i32_28 = arith.constant 32 : i32
    %71 = tpu.dynamic_rotate %66 by %c32_i32_28 dim 1 : vector<8x256xf32>, i32 -> vector<8x256xf32>
    %cst_29 = arith.constant 0.000000e+00 : f32
    %72 = vector.shape_cast %68 : vector<1x256xi1> to vector<1x256xi1>
    %73 = vector.broadcast %72 : vector<1x256xi1> to vector<8x256xi1>
    %74 = vector.broadcast %cst_29 : f32 to vector<8x256xf32>
    %75 = arith.select %73, %71, %74 : vector<8x256xi1>, vector<8x256xf32>
    %c224_i32_30 = arith.constant 224 : i32
    %76 = tpu.dynamic_rotate %66 by %c224_i32_30 dim 1 : vector<8x256xf32>, i32 -> vector<8x256xf32>
    %cst_31 = arith.constant 0.000000e+00 : f32
    %77 = vector.shape_cast %70 : vector<1x256xi1> to vector<1x256xi1>
    %78 = vector.broadcast %77 : vector<1x256xi1> to vector<8x256xi1>
    %79 = vector.broadcast %cst_31 : f32 to vector<8x256xf32>
    %80 = arith.select %78, %76, %79 : vector<8x256xi1>, vector<8x256xf32>
    %81 = tpu.concatenate %75, %66, %80 in 0 : vector<8x256xf32>, vector<8x256xf32>, vector<8x256xf32> -> vector<24x256xf32>
    %c2 = arith.constant 2 : index
    %c0_32 = arith.constant 0 : index
    %c0_33 = arith.constant 0 : index
    %82 = vector.load %arg2[%c2, %c0_32, %c0_33] : memref<4x8x24xf32, #tpu.memory_space<vmem>>, vector<1x8x24xf32>
    %83 = vector.shape_cast %82 : vector<1x8x24xf32> to vector<8x24xf32>
    %cst_34 = arith.constant dense<0.000000e+00> : vector<8x256xf32>
    %84 = tpu.matmul %83, %81, %cst_34 {dimension_numbers = #tpu.dot_dimension_numbers<[1], [0], [0], [1], [0, 0, 1, 1], [], []>} : vector<8x24xf32>, vector<24x256xf32>, vector<8x256xf32> -> vector<8x256xf32>
    %c2_35 = arith.constant 2 : index
    %c0_36 = arith.constant 0 : index
    %c0_37 = arith.constant 0 : index
    %85 = vector.load %arg3[%c2_35, %c0_36, %c0_37] : memref<4x8x1xf32, #tpu.memory_space<vmem>>, vector<1x8x1xf32>
    %86 = vector.shape_cast %85 : vector<1x8x1xf32> to vector<8x1xf32>
    %87 = vector.broadcast %86 : vector<8x1xf32> to vector<8x256xf32>
    %88 = arith.addf %84, %87 : vector<8x256xf32>
    %cst_38 = arith.constant 0.000000e+00 : f32
    %89 = vector.broadcast %cst_38 : f32 to vector<8x256xf32>
    %90 = arith.maximumf %88, %89 : vector<8x256xf32>
    %c2_i32 = arith.constant 2 : i32
    %91 = vector.broadcast %c2_i32 : i32 to vector<1x256xi32>
    %92 = arith.cmpi sge, %18, %91 : vector<1x256xi32>
    %c14_i32 = arith.constant 14 : i32
    %93 = vector.broadcast %c14_i32 : i32 to vector<1x256xi32>
    %94 = arith.cmpi slt, %18, %93 : vector<1x256xi32>
    %c2_i32_39 = arith.constant 2 : i32
    %95 = tpu.dynamic_rotate %90 by %c2_i32_39 dim 1 : vector<8x256xf32>, i32 -> vector<8x256xf32>
    %cst_40 = arith.constant 0.000000e+00 : f32
    %96 = vector.shape_cast %92 : vector<1x256xi1> to vector<1x256xi1>
    %97 = vector.broadcast %96 : vector<1x256xi1> to vector<8x256xi1>
    %98 = vector.broadcast %cst_40 : f32 to vector<8x256xf32>
    %99 = arith.select %97, %95, %98 : vector<8x256xi1>, vector<8x256xf32>
    %c254_i32 = arith.constant 254 : i32
    %100 = tpu.dynamic_rotate %90 by %c254_i32 dim 1 : vector<8x256xf32>, i32 -> vector<8x256xf32>
    %cst_41 = arith.constant 0.000000e+00 : f32
    %101 = vector.shape_cast %94 : vector<1x256xi1> to vector<1x256xi1>
    %102 = vector.broadcast %101 : vector<1x256xi1> to vector<8x256xi1>
    %103 = vector.broadcast %cst_41 : f32 to vector<8x256xf32>
    %104 = arith.select %102, %100, %103 : vector<8x256xi1>, vector<8x256xf32>
    %105 = tpu.concatenate %99, %90, %104 in 0 : vector<8x256xf32>, vector<8x256xf32>, vector<8x256xf32> -> vector<24x256xf32>
    %c3 = arith.constant 3 : index
    %c0_42 = arith.constant 0 : index
    %c0_43 = arith.constant 0 : index
    %106 = vector.load %arg2[%c3, %c0_42, %c0_43] : memref<4x8x24xf32, #tpu.memory_space<vmem>>, vector<1x8x24xf32>
    %107 = vector.shape_cast %106 : vector<1x8x24xf32> to vector<8x24xf32>
    %cst_44 = arith.constant dense<0.000000e+00> : vector<8x256xf32>
    %108 = tpu.matmul %107, %105, %cst_44 {dimension_numbers = #tpu.dot_dimension_numbers<[1], [0], [0], [1], [0, 0, 1, 1], [], []>} : vector<8x24xf32>, vector<24x256xf32>, vector<8x256xf32> -> vector<8x256xf32>
    %c3_45 = arith.constant 3 : index
    %c0_46 = arith.constant 0 : index
    %c0_47 = arith.constant 0 : index
    %109 = vector.load %arg3[%c3_45, %c0_46, %c0_47] : memref<4x8x1xf32, #tpu.memory_space<vmem>>, vector<1x8x1xf32>
    %110 = vector.shape_cast %109 : vector<1x8x1xf32> to vector<8x1xf32>
    %111 = vector.broadcast %110 : vector<8x1xf32> to vector<8x256xf32>
    %112 = arith.addf %108, %111 : vector<8x256xf32>
    %113 = arith.addf %112, %1 : vector<8x256xf32>
    %cst_48 = arith.constant 0.000000e+00 : f32
    %114 = vector.broadcast %cst_48 : f32 to vector<8x256xf32>
    %115 = arith.maximumf %113, %114 : vector<8x256xf32>
    %c0_49 = arith.constant 0 : index
    %c0_50 = arith.constant 0 : index
    %c0_51 = arith.constant 0 : index
    %116 = vector.load %arg4[%c0_49, %c0_50, %c0_51] : memref<1x8x256xf32, #tpu.memory_space<vmem>>, vector<1x8x256xf32>
    %117 = vector.shape_cast %116 : vector<1x8x256xf32> to vector<8x256xf32>
    %118 = vector.shape_cast %115 : vector<8x256xf32> to vector<1x8x256xf32>
    tpu.vector_store %arg4[%c0_49, %c0_50, %c0_51], %118 {strides = array<i32>} : memref<1x8x256xf32, #tpu.memory_space<vmem>>, vector<1x8x256xf32>,
    return
  }
  func.func @transform_0(%arg0: i32) -> (i32, i32, i32) {
    %c0_i32 = arith.constant 0 : i32
    %c0_i32_0 = arith.constant 0 : i32
    %c0_i32_1 = arith.constant 0 : i32
    return %arg0, %c0_i32, %c0_i32_0 : i32, i32, i32
  }
  func.func @transform_1(%arg0: i32) -> (i32, i32, i32) {
    %c0_i32 = arith.constant 0 : i32
    %c0_i32_0 = arith.constant 0 : i32
    %c0_i32_1 = arith.constant 0 : i32
    %c0_i32_2 = arith.constant 0 : i32
    return %c0_i32, %c0_i32_0, %c0_i32_1 : i32, i32, i32
  }
  func.func @transform_2(%arg0: i32) -> (i32, i32, i32) {
    %c0_i32 = arith.constant 0 : i32
    %c0_i32_0 = arith.constant 0 : i32
    %c0_i32_1 = arith.constant 0 : i32
    %c0_i32_2 = arith.constant 0 : i32
    return %c0_i32, %c0_i32_0, %c0_i32_1 : i32, i32, i32
  }
  func.func @transform_3(%arg0: i32) -> (i32, i32, i32) {
    %c0_i32 = arith.constant 0 : i32
    %c0_i32_0 = arith.constant 0 : i32
    %c0_i32_1 = arith.constant 0 : i32
    return %arg0, %c0_i32, %c0_i32_0 : i32, i32, i32
  }
}

</mosaic_0001>

<bundles_post_ra>
// kernel: tpu_custom_call.1
= control target key start
LH: loop header
LB: loop body
LE: loop exit
PB: predicated region body
PF: predicated region fallthrough
CT: control target
= control target key end

     0   :  { %8 = vsyncpa [#allocation3], 0  ;;  %s1239_s0 = inlined_call_operand.vmem [shape: f32[2,8,256], index: 0, kind: input, shape index: {}]   ;;  %s1240_s1 = inlined_call_operand.hbm [shape: f32[4,8,24], index: 1, kind: input, shape index: {}]   ;;  %s1241_s2 = inlined_call_operand.vmem [shape: f32[4,8,1], index: 2, kind: input, shape index: {}]   ;;  %s1242_s3 = inlined_call_operand.hbm [shape: f32[2,8,256], index: 3, kind: output, shape index: {}]  }
   0x1   :  { %9 = vsyncpa [#allocation4], 0 }
   0x2   :  { %11 = vsyncpa [#allocation4 + $0x1], 0  ;;  %s1035_s12 = smov 0   ;;  %s1037_s13 = smov 0  }
   0x3   :  { %s1039_s14 = smov 0   ;;  %s1041_s15 = smov 0  }
   0x4 LB: > { %s1056_s16 = sadd.s32 4294967295, %s998_s15   ;;  %s762_s17 = sadd.s32 4294967294, %s998_s15   ;;  %s998_s15 = sphi %s1041_s15, %s1258_s15   ;;  %s994_s14 = sphi %s1039_s14, %s1257_s14   ;;  %s990_s13 = sphi %s1037_s13, %s1256_s13   ;;  %s986_s12 = sphi %s1035_s12, %s1255_s12  }
   0x5   : > { %s1060_s18 = sadd.s32 1, %s998_s15   ;;  %s92_s19 = sadd.s32 1, %s994_s14 }
   0x6   : > { %s89_s20 = ssub.s32 %s998_s15, %s1060_s18  ;;  %p102_p0 = scmp.ne.s32.totalorder %s994_s14, %s990_s13 }
   0x7   : > { %p90_p1 = scmp.eq.s32.totalorder %s89_s20, 0  ;;  %p103_p2 = scmp.eq.s32.totalorder %s1056_s16, 1 }
   0x8   : > { %p108_p3 = scmp.ne.s32.totalorder %s990_s13, %s986_s12  ;;  %p109_p4 = scmp.eq.s32.totalorder %s762_s17, 1 }
   0x9   : > { %s1071_s21 = scalar_select %p90_p1, %s994_s14, %s92_s19  }
   0xa   : > { %p1073_p5 = por %p103_p2, %p102_p0  ;;  %p1077_p6 = por %p109_p4, %p108_p3 }
   0xb   : > { %p763_p7 = scmp.ge.s32.totalorder %s998_s15, 1  ;;  %p116_p8 = scmp.lt.s32.totalorder %s998_s15, 3 }
   0xc   : > { %s1246_s22 = scalar_select %p1073_p5, 1, 0 }
   0xd   : > { %s1247_s23 = scalar_select %p1077_p6, 1, 0 }
   0xe   : > { %p1243_p9 = scmp.eq.s32.totalorder %s1056_s16, 0  ;;  %p1084_p10 = pnand %p763_p7, %p116_p8 }
   0xf   : > { %s1000_s25 = smov [#allocation2]   ;;  %s904_s30 = scalar_lea.hbm %s1240_s1, 512 }
  0x10   : > { %s1248_s24 = scalar_select %p1084_p10, 1, 0 }
  0x11   : > { %s128_s26 = sshll.u32 %s1000_s25, 4  ;;  %p825_p11 = pneg %p1084_p10  ;;  %s129_s26 = int_to_ptr.vmem [resolvable:$true] %s128_s26 }
  0x12   : > { %p905_p13 = scmp.ne.s32.totalorder %s1240_s1, %s904_s30  ;;  %p911_p3 = scmp.lt.u32.totalorder %s904_s30, %s1240_s1 }
  0x13   : > { %p1092_p12 = pnand %p1243_p9, %p825_p11 }
  0x15   : > { %p906_p0 = pneg %p1092_p12 }
  0x17   : > { %p907_p1 = pnand %p906_p0, %p905_p13 }
  0x19   : > { %p908_p2 = pneg %p907_p1 }
  0x1b   : > { %p913_p4 = pnand %p911_p3, %p908_p2 }
  0x1d   : > { %916 = shalt.err (!%p913_p4)
}
  0x1e   : > { %s917_s8 = scalar_lea.vmem %s129_s26, 512  ;;  %p925_p9 = scmp.lt.s32.totalorder %s129_s26, %s129_s26 }
  0x1f   : > { %p918_p7 = scmp.ne.s32.totalorder %s129_s26, %s917_s8  ;;  %p926_p6 = scmp.lt.s32.totalorder %s917_s8, %s917_s8 }
  0x21   : > { %p920_p8 = pnand %p918_p7, %p906_p0  ;;  %p927_p5 = por %p926_p6, %p925_p9 }
  0x23   : > { %p921_p11 = pneg %p920_p8 }
  0x25   : > { %p928_p10 = pnand %p927_p5, %p921_p11 }
  0x27   : > { %931 = shalt.err (!%p928_p10)
}
  0x28   : > { %s1001_s9 = smov 128   ;;  %s1002_s10 = smov 8  }
  0x29   : > { %828 = dma.hbm_to_vmem [thread:$0]  (!%p1092_p12), %s1240_s1, 512, %s129_s26, [#allocation3], %s1001_s9, %s1001_s9, %s1002_s10  }
  0x2a   : > { %p1250_p13 = scmp.ne.s32.totalorder %s1248_s24, 0 }
  0x2b   : > { %p1251_p1 = scmp.eq.s32.totalorder (!%p1250_p13), %s1056_s16, 0 }
  0x2c   : > { %155 = sbr.rel (%p1250_p13) target bundleno = 1455 (0x5af), region = 32 }
  0x33   : > { %977 = dma.done.wait (%p1251_p1), [#allocation3], 512   ;;  %p1252_p0 = pmov %p1251_p1 }
  0x34   : > { %p179_p5 = scmp.lt.s32.totalorder %s1056_s16, 1  ;;  %v1003_v2 = vmov 0.0   ;;  %s1004_s24 = smov 112   ;;  %v1005_v4 = vmov 0   ;;  %v244_v5 = vld [vmem:[%s1241_s2] sm:$0xff]  ;;  %v186_v6 = vlaneseq  ;;  %vm1007_vm3 = vmmov 1  }
  0x35   : > { %979 = vsyncadd (%p1252_p0), [#allocation3], 4294966784  ;;  %318 = vmatprep.mubr.f32.mxu0 %v1003_v2  ;;  %433 = vmatprep.mubr.f32.mxu1 %v1003_v2  ;;  %s1006_s30 = smov 16   ;;  %v243_v20 = vld [vmem:[#allocation2] sm:$0xff]  ;;  %vm250_vm6 = vcmask 195584   ;;  %s1008_s4 = smov 127  }
  0x36   : > { %s180_s19 = scalar_select %p179_p5, %s1056_s16, 1  ;;  %887 = vset.pattern.permute.xlu1 %v1005_v4  ;;  %903 = vset.pattern.permute.xlu0 %v1005_v4  ;;  %v1136_v7 = vand.u32 127, %v186_v6  ;;  %v774_v29 = vld [vmem:[%s1241_s2 + $0x8] sm:$0xff]  ;;  %v780_v52 = vld [vmem:[%s1241_s2 + $0x10] sm:$0xff] }
  0x37   : > { %s1009_s7 = smov 1   ;;  %v358_v42 = vld [vmem:[#allocation2 + $0x8] sm:$0xff]  ;;  %s1010_s8 = smov 96   ;;  %v473_v63 = vld [vmem:[#allocation2 + $0x10] sm:$0xff] }
  0x38   : > { %s795_s20 = sshll.u32 %s180_s19, 4  ;;  %vm221_vm0 = vcmp.lt.s32.totalorder %v1136_v7, 16  ;;  %vm213_vm1 = vcmp.ge.s32.totalorder %v1136_v7, 16  ;;  %v1141_v11 = vadd.s32 128, %v1136_v7  ;;  %vm234_vm2 = vcmp.lt.s32.totalorder %v1136_v7, 112  ;;  %s1011_s11 = smov 32  }
  0x39   : > { %s183_s28 = scalar_lea.vmem %s1239_s0, %s795_s20  ;;  %vm800_vm4 = vmpackc.low %vm1007_vm3, %vm213_vm1  ;;  %v1157_v31 = vand.u32 15, %v1136_v7  ;;  %vm335_vm8 = vcmp.lt.s32.totalorder %v1136_v7, 1  ;;  %vm348_vm11 = vcmp.lt.s32.totalorder %v1136_v7, 127  ;;  %vm450_vm15 = vcmp.lt.s32.totalorder %v1136_v7, 32  ;;  %s1012_s17 = smov 126  }
  0x3a   : > { %v1123_v0 = vld [vmem:[%s183_s28] sm:$0xff]  ;;  %v1125_v1 = vld [vmem:[%s183_s28 + $0x8] sm:$0xff]  ;;  %vm216_vm5 = vcmp.lt.s32.totalorder %v1141_v11, 240  ;;  %v1154_v30 = vand.u32 15, %v1141_v11  ;;  %vm463_vm1 = vcmp.lt.s32.totalorder %v1136_v7, 96  ;;  %s1013_s25 = smov 2  }
  0x3b   : > { %v882_v3 = vpack.i.bf16 %v1125_v1, %v1123_v0  ;;  %232 = vrot.lane.b32.xlu1 %v1125_v1, %s1004_s24  ;;  %vm327_vm9 = vcmp.ge.s32.totalorder %v1157_v31, 1  ;;  %vm329_vm14 = vcmp.lt.s32.totalorder %v1157_v31, 15  ;;  %s176_s27 = sand.u32 1, %s990_s13   ;;  %p1253_p9 = scmp.ne.s32.totalorder %s1246_s22, 0 }
  0x3c   : > { %vm328_vm7 = vcmp.ge.s32.totalorder %v1154_v30, 1  ;;  %vm806_vm12 = vmpackc.low %vm1007_vm3, %vm327_vm9  ;;  %vm330_vm13 = vcmp.lt.s32.totalorder %v1154_v30, 15  ;;  %s768_s28 = sshll.u32 %s176_s27, 4  ;;  %s677_s6 = scalar_lea.sflag [#allocation4], %s176_s27 }
  0x3d   : > { %883 = vrot.lane.b32.xlu0 %v882_v3, %s1006_s30  ;;  %vm803_vm10 = vmpackc.low %vm1007_vm3, %vm328_vm7  ;;  %vm558_vm7 = vcmp.ge.s32.totalorder %v1154_v30, 2  ;;  %s178_s26 = scalar_lea.vmem [#allocation5], %s768_s28 }
  0x3e   : > { %vm814_vm9 = vmpackc.low %vm1007_vm3, %vm558_vm7  ;;  %s691_s29 = sshll.u32 %s178_s26, 4  ;;  %s1199_s29 = int_to_ptr.vmem [resolvable:$true] %s691_s29 }
  0x3f   : > { %247 = vperm.xlu1 %887, %v244_v5  }
  0x41   : > { %230 = vrot.lane.b32.xlu0 %v1123_v0, %s1004_s24  ;;  %s796_s24 = sshll.u32 %s1056_s16, 8  ;;  %s932_s16 = scalar_lea.vmem %s1199_s29, 256 }
  0x42   : > { %s1197_s5 = scalar_lea.hbm %s1242_s3, %s796_s24  ;;  %p933_p6 = scmp.ne.s32.totalorder %s1199_s29, %s932_s16 }
  0x44   : > { %p934_p10 = pnand %p933_p6, %p1253_p9 }
  0x46   : > { %p935_p12 = pneg %p934_p10 }
  0xad   : > { %v233_v12 = vpop.permute.xlu1 %232 }
  0xaf   : > { %v884_v8 = vpop.permute.xlu0 %883 }
  0xb0   : > { %v886_v9 = vunpack.i.h.bf16 %v884_v8  ;;  %v885_v10 = vunpack.i.l.bf16 %v884_v8 }
  0xb2   : > { %v222_v13 = vsel %vm221_vm0, %v885_v10, %v886_v9  ;;  %v223_v14 = vsel %vm221_vm0, %v886_v9, %v885_v10  ;;  %vm442_vm0 = vcmp.ge.s32.totalorder %v1136_v7, 32 }
  0xb3   : > { %v797_v15 = vpack.c.bf16 %v1125_v1, %v222_v13  ;;  %v799_v16 = vpack.c.bf16 %v1123_v0, %v223_v14  ;;  %v231_v17 = vpop.permute.xlu0 %230 }
  0xb4   : > { %v236_v18 = vsel %vm234_vm2, %v233_v12, %v231_v17  ;;  %v235_v19 = vsel %vm234_vm2, %v231_v17, %v233_v12  ;;  %vm811_vm2 = vmpackc.low %vm1007_vm3, %vm442_vm0  ;;  %v784_v12 = vld [vmem:[%s1241_s2 + $0x18] sm:$0xff] }
  0xb5   : > { %798 = vmatprep.subr.bf16.mxu0 %v797_v15 }
  0xb6   : > { %801 = vmatpush1.bf16.msk.msra.mxu0 %vm800_vm4, %v799_v16  ;;  %vm445_vm4 = vcmp.lt.s32.totalorder %v1141_v11, 224 }
  0xb7   : > { %772 = vmatprep.subr.msk.mxu0 %vm216_vm5, %v236_v18  ;;  %vm565_vm5 = vcmp.lt.s32.totalorder %v1136_v7, 2 }
  0xba   : > { %259 = vmatpush1.msra.mxu0 %v235_v19 }
  0xbb   : > { %773 = vmatmul.mubr.msk.f32.vlgmr.msra.gmra.mrb[0].mxu0 %vm250_vm6, %v243_v20 }
  0xbc   : > { %548 = vmatprep.mubr.f32.mxu0 %v1003_v2 }
  0xbe   : > { %v248_v21 = vpop.permute.xlu1 %247 }
 0x18e   : > { %v320_v22 = vpop.f32.mrb[0].mxu0 }
 0x18f   : > { %v321_v23 = vadd.f32 %v320_v22, %v248_v21  ;;  %v322_v24 = vpop.f32.mrb[1].mxu0 }
 0x190   : > { %v323_v25 = vadd.f32 %v322_v24, %v248_v21 }
 0x191   : > { %v325_v26 = vmax.f32 %v321_v23, 0.0  ;;  %v588_v23 = vld [vmem:[#allocation2 + $0x18] sm:$0xff] }
 0x192   : > { %v326_v27 = vmax.f32 %v323_v25, 0.0 }
 0x193   : > { %344 = vrot.lane.b32.xlu1 %v325_v26, %s1008_s4 }
 0x194   : > { %v888_v28 = vpack.i.bf16 %v326_v27, %v325_v26 }
 0x196   : > { %889 = vrot.lane.b32.xlu0 %v888_v28, %s1009_s7  ;;  %s1014_s7 = smov [#allocation5]  }
 0x197   : > { %363 = vperm.xlu1 %887, %v774_v29  }
 0x19a   : > { %346 = vrot.lane.b32.xlu0 %v326_v27, %s1008_s4 }
 0x205   : > { %v345_v40 = vpop.permute.xlu1 %344 }
 0x208   : > { %v890_v32 = vpop.permute.xlu0 %889 }
 0x209   : > { %v892_v33 = vunpack.i.h.bf16 %v890_v32  ;;  %v891_v34 = vunpack.i.l.bf16 %v890_v32 }
 0x20b   : > { %v336_v35 = vsel %vm335_vm8, %v891_v34, %v892_v33  ;;  %v337_v36 = vsel %vm335_vm8, %v892_v33, %v891_v34  ;;  %vm557_vm8 = vcmp.ge.s32.totalorder %v1157_v31, 2 }
 0x20c   : > { %v347_v37 = vpop.permute.xlu0 %346  ;;  %v802_v38 = vpack.c.bf16 %v326_v27, %v336_v35  ;;  %v805_v39 = vpack.c.bf16 %v325_v26, %v337_v36 }
 0x20d   : > { %v350_v41 = vsel %vm348_vm11, %v347_v37, %v345_v40  ;;  %v349_v43 = vsel %vm348_vm11, %v345_v40, %v347_v37  ;;  %vm817_vm11 = vmpackc.low %vm1007_vm3, %vm557_vm8 }
 0x20e   : > { %804 = vmatprep.subr.msk.bf16.mxu1 %vm803_vm10, %v802_v38  ;;  %vm578_vm10 = vcmp.lt.s32.totalorder %v1136_v7, 126 }
 0x20f   : > { %807 = vmatpush1.bf16.msk.msra.mxu1 %vm806_vm12, %v805_v39  ;;  %vm560_vm12 = vcmp.lt.s32.totalorder %v1154_v30, 14 }
 0x210   : > { %777 = vmatprep.subr.msk.mxu1 %vm330_vm13, %v350_v41  ;;  %vm559_vm13 = vcmp.lt.s32.totalorder %v1157_v31, 14 }
 0x213   : > { %778 = vmatpush1.msk.msra.mxu1 %vm329_vm14, %v349_v43 }
 0x214   : > { %779 = vmatmul.mubr.msk.f32.vlgmr.msra.gmra.mrb[0].mxu1 %vm250_vm6, %v358_v42 }
 0x215   : > { %663 = vmatprep.mubr.f32.mxu1 %v1003_v2 }
 0x216   : > { %v364_v44 = vpop.permute.xlu1 %363 }
 0x2e7   : > { %v435_v45 = vpop.f32.mrb[0].mxu1 }
 0x2e8   : > { %v436_v46 = vadd.f32 %v435_v45, %v364_v44  ;;  %v437_v47 = vpop.f32.mrb[1].mxu1 }
 0x2e9   : > { %v438_v48 = vadd.f32 %v437_v47, %v364_v44 }
 0x2ea   : > { %v440_v49 = vmax.f32 %v436_v46, 0.0 }
 0x2eb   : > { %v441_v50 = vmax.f32 %v438_v48, 0.0 }
 0x2ec   : > { %459 = vrot.lane.b32.xlu1 %v440_v49, %s1010_s8 }
 0x2ed   : > { %v893_v51 = vpack.i.bf16 %v441_v50, %v440_v49 }
 0x2ef   : > { %894 = vrot.lane.b32.xlu0 %v893_v51, %s1011_s11 }
 0x2f0   : > { %478 = vperm.xlu1 %887, %v780_v52  }
 0x2f3   : > { %461 = vrot.lane.b32.xlu0 %v441_v50, %s1010_s8  ;;  %s936_s8 = sshll.u32 %s1014_s7, 4  ;;  %s937_s8 = int_to_ptr.vmem [resolvable:$false] %s936_s8 }
 0x2f4   : > { %s938_s9 = scalar_lea.vmem %s937_s8, 512  ;;  %p939_p2 = scmp.lt.s32.totalorder %s1199_s29, %s937_s8 }
 0x2f5   : > { %p940_p3 = scmp.lt.s32.totalorder %s938_s9, %s932_s16 }
 0x2f7   : > { %p941_p4 = por %p940_p3, %p939_p2 }
 0x2f9   : > { %p942_p7 = pnand %p941_p4, %p935_p12 }
 0x35e   : > { %v460_v61 = vpop.permute.xlu1 %459 }
 0x361   : > { %v895_v53 = vpop.permute.xlu0 %894 }
 0x362   : > { %v897_v54 = vunpack.i.h.bf16 %v895_v53  ;;  %v896_v55 = vunpack.i.l.bf16 %v895_v53 }
 0x364   : > { %v452_v56 = vsel %vm450_vm15, %v897_v54, %v896_v55  ;;  %v451_v57 = vsel %vm450_vm15, %v896_v55, %v897_v54 }
 0x365   : > { %v810_v58 = vpack.c.bf16 %v440_v49, %v452_v56  ;;  %v462_v59 = vpop.permute.xlu0 %461  ;;  %v808_v60 = vpack.c.bf16 %v441_v50, %v451_v57 }
 0x366   : > { %v465_v62 = vsel %vm463_vm1, %v462_v59, %v460_v61  ;;  %v464_v2 = vsel %vm463_vm1, %v460_v61, %v462_v59 }
 0x367   : > { %809 = vmatprep.subr.bf16.mxu0 %v808_v60 }
 0x368   : > { %812 = vmatpush1.bf16.msk.msra.mxu0 %vm811_vm2, %v810_v58 }
 0x369   : > { %782 = vmatprep.subr.msk.mxu0 %vm445_vm4, %v465_v62 }
 0x36c   : > { %489 = vmatpush1.msra.mxu0 %v464_v2 }
 0x36d   : > { %783 = vmatmul.mubr.msk.f32.vlgmr.msra.gmra.mrb[2].mxu0 %vm250_vm6, %v473_v63 }
 0x36f   : > { %v479_v3 = vpop.permute.xlu1 %478 }
 0x440   : > { %v550_v4 = vpop.f32.mrb[2].mxu0 }
 0x441   : > { %v551_v5 = vadd.f32 %v550_v4, %v479_v3  ;;  %v552_v6 = vpop.f32.mrb[3].mxu0 }
 0x442   : > { %v553_v8 = vadd.f32 %v552_v6, %v479_v3 }
 0x443   : > { %v555_v9 = vmax.f32 %v551_v5, 0.0 }
 0x444   : > { %v556_v10 = vmax.f32 %v553_v8, 0.0 }
 0x445   : > { %574 = vrot.lane.b32.xlu1 %v555_v9, %s1012_s17 }
 0x446   : > { %v898_v11 = vpack.i.bf16 %v556_v10, %v555_v9 }
 0x448   : > { %899 = vrot.lane.b32.xlu0 %v898_v11, %s1013_s25 }
 0x449   : > { %593 = vperm.xlu1 %887, %v784_v12  }
 0x44c   : > { %576 = vrot.lane.b32.xlu0 %v556_v10, %s1012_s17 }
 0x4b7   : > { %v575_v21 = vpop.permute.xlu1 %574 }
 0x4ba   : > { %v900_v13 = vpop.permute.xlu0 %899 }
 0x4bb   : > { %v902_v14 = vunpack.i.h.bf16 %v900_v13  ;;  %v901_v15 = vunpack.i.l.bf16 %v900_v13 }
 0x4bd   : > { %v566_v16 = vsel %vm565_vm5, %v901_v15, %v902_v14  ;;  %v567_v17 = vsel %vm565_vm5, %v902_v14, %v901_v15 }
 0x4be   : > { %v813_v18 = vpack.c.bf16 %v556_v10, %v566_v16  ;;  %v816_v19 = vpack.c.bf16 %v555_v9, %v567_v17  ;;  %v577_v20 = vpop.permute.xlu0 %576 }
 0x4bf   : > { %v580_v22 = vsel %vm578_vm10, %v577_v20, %v575_v21  ;;  %v579_v24 = vsel %vm578_vm10, %v575_v21, %v577_v20 }
 0x4c0   : > { %815 = vmatprep.subr.msk.bf16.mxu1 %vm814_vm9, %v813_v18 }
 0x4c1   : > { %818 = vmatpush1.bf16.msk.msra.mxu1 %vm817_vm11, %v816_v19 }
 0x4c2   : > { %787 = vmatprep.subr.msk.mxu1 %vm560_vm12, %v580_v22 }
 0x4c5   : > { %788 = vmatpush1.msk.msra.mxu1 %vm559_vm13, %v579_v24 }
 0x4c6   : > { %789 = vmatmul.mubr.msk.f32.vlgmr.msra.gmra.mrb[2].mxu1 %vm250_vm6, %v588_v23 }
 0x4c8   : > { %v594_v7 = vpop.permute.xlu1 %593 }
 0x599   : > { %v665_v25 = vpop.f32.mrb[2].mxu1 }
 0x59a   : > { %v666_v26 = vadd.f32 %v665_v25, %v594_v7  ;;  %v667_v27 = vpop.f32.mrb[3].mxu1 }
 0x59b   : > { %v668_v28 = vadd.f32 %v667_v27, %v594_v7 }
 0x59c   : > { %v670_v29 = vadd.f32 %v666_v26, %v1123_v0 }
 0x59d   : > { %v671_v30 = vadd.f32 %v668_v28, %v1125_v1 }
 0x59e   : > { %v672_v31 = vmax.f32 %v670_v29, 0.0 }
 0x59f   : > { %v673_v32 = vmax.f32 %v671_v30, 0.0 }
 0x5a0   : > { %674 = vst [vmem:[%s178_s26] sm:$0xff] %v672_v31 }
 0x5a1   : > { %675 = vst [vmem:[%s178_s26 + $0x8] sm:$0xff] %v673_v32 }
 0x5a2   : > { %945 = shalt.err (!%p942_p7)
}
 0x5a3   : > { %s946_s10 = scalar_lea.hbm %s1197_s5, 256  ;;  %s950_s19 = scalar_lea.hbm %s1242_s3, 512 }
 0x5a4   : > { %p947_p8 = scmp.ne.s32.totalorder %s1197_s5, %s946_s10  ;;  %p951_p1 = scmp.lt.u32.totalorder %s1197_s5, %s1242_s3 }
 0x5a5   : > { %p952_p0 = scmp.lt.u32.totalorder %s950_s19, %s946_s10  ;;  %p954_p6 = scmp.lt.u32.totalorder %s946_s10, %s1197_s5 }
 0x5a6   : > { %p948_p11 = pnand %p947_p8, %p1253_p9 }
 0x5a7   : > { %p953_p5 = por %p952_p0, %p951_p1 }
 0x5a8   : > { %p949_p13 = pneg %p948_p11 }
 0x5a9   : > { %p955_p10 = por %p954_p6, %p953_p5 }
 0x5ab   : > { %p956_p12 = pnand %p955_p10, %p949_p13 }
 0x5ad   : > { %959 = shalt.err (!%p956_p12)
}
 0x5ae   : > { %823 = dma.vmem_to_hbm [thread:$0]  (%p1253_p9), %s1199_s29, 256, %s1197_s5, %s677_s6  }
 0x5af PF: > { %p835_p2 = scmp.ge.s32.totalorder %s998_s15, 2  ;;  %s703_s27 = sand.u32 1, %s986_s12  }
 0x5b0   : > { %p1254_p3 = scmp.ne.s32.totalorder %s1247_s23, 0  ;;  %s704_s28 = scalar_lea.sflag [#allocation4], %s703_s27 }
 0x5b2   : > { %p830_p4 = pnand %p835_p2, %p1254_p3 }
 0x5b4   : > { %981 = dma.done.wait (!%p830_p4), %s704_s28, 256  }
 0x5b5   : > { %983 = vsyncadd (!%p830_p4), %s704_s28, 4294967040  ;;  %p14_p7 = scmp.ge.s32.totalorder %s1060_s18, 4   ;;  %s1255_s12 = smov %s990_s13 }
 0x5b6   : > { %s1256_s13 = smov %s994_s14  ;;  %s1257_s14 = smov %s1071_s21 }
 0x5b7   : > { %s1258_s15 = smov %s1060_s18  ;;  %16 = sbr.rel (!%p14_p7) target bundleno = 4 (0x4), region = 78 }
 0x5be   :  { %709 = vsyncpa [#allocation3], 1 }
 0x5bf   :  { %711 = vsyncpa [#allocation3 + $0x1], 1 }
 0x5c0   :  { %712 = vsyncpa [#allocation4], 1 }
 0x5c1   :  { %714 = vsyncpa [#allocation4 + $0x1], 1 }

</bundles_post_ra>
